<compile_context>
chip_gen: v7x
topology: tpu7x:2x2x1
jax: 0.10.0
libtpu: 0.0.40
codegen_flags: <defaults>
</compile_context>

<pallas_src>
import math

import jax
import jax.numpy as jnp
from jax.experimental import pallas as pl
from jax.experimental.pallas import tpu as pltpu


def _round_up(x, m):
    return (x + m - 1) // m * m


def mlp_kernel(x_ref, wgu_ref, wd_ref, o_ref):
    """Fused SwiGLU MLP row-tile: o = (silu(x@Wg) * (x@Wu)) @ Wd.

    Gate/up projections are a single MXU matmul against the concatenated
    [C, 2*Hp] weight; operands go to the MXU in their native dtype with f32
    accumulation. SiLU (EUP sigmoid) and the elementwise multiply run in f32
    on the accumulator, then the result is cast to the weight dtype for the
    down projection.
    """
    hp = wd_ref.shape[0]
    x = x_ref[...]

    gu = jnp.dot(x, wgu_ref[...], preferred_element_type=jnp.float32)
    gate = gu[:, :hp]           # lane-aligned static slices (hp % 128 == 0)
    up = gu[:, hp:]

    h = gate * jax.nn.sigmoid(gate) * up            # f32; silu(0)*0 == 0 exact

    out = jnp.dot(h.astype(wd_ref.dtype), wd_ref[...],
                  preferred_element_type=jnp.float32)
    o_ref[...] = out.astype(o_ref.dtype)


def mlp_pallas(x, w_gate, w_up, w_down, *, tm=512):
    """x: [B, T, C]; w_gate/w_up: [C, H]; w_down: [H, C]  ->  [B, T, C]."""
    B, T, C = x.shape
    H = w_gate.shape[1]
    M = B * T
    dtype = x.dtype

    # --- pad hidden dim to a multiple of 128 lanes (numerically exact) ---
    Hp = _round_up(H, 128)
    if Hp != H:
        w_gate = jnp.pad(w_gate, ((0, 0), (0, Hp - H)))
        w_up = jnp.pad(w_up, ((0, 0), (0, Hp - H)))
        w_down = jnp.pad(w_down, ((0, Hp - H), (0, 0)))

    # --- fuse gate + up projections into one matmul operand ---
    w_gu = jnp.concatenate([w_gate, w_up], axis=1)           # [C, 2*Hp]

    # --- tile / pad the row dimension (pad rows are zero -> zero output) ---
    tm_eff = min(tm, _round_up(M, 8))
    Mp = _round_up(M, tm_eff)
    x2d = x.reshape(M, C)
    if Mp != M:
        x2d = jnp.pad(x2d, ((0, Mp - M), (0, 0)))
    grid = (Mp // tm_eff,)

    # --- VMEM budget: resident weights + double-buffered row tiles ---
    # TODO(synk): for very large H on v7x (64 MiB VMEM) add a reduction grid
    # axis over Hp ("arbitrary") with a pl.when-gated f32 accumulator instead
    # of keeping both weight matrices fully resident.
    itemsize = jnp.dtype(dtype).itemsize
    weight_bytes = (w_gu.size + w_down.size) * itemsize
    io_bytes = 2 * 2 * tm_eff * C * itemsize            # double-buffered x/out
    inter_bytes = tm_eff * (3 * Hp) * 4                 # gu + h f32 temps
    vmem_budget = int(1.5 * (weight_bytes + io_bytes + inter_bytes)) + (8 << 20)
    vmem_budget = max(32 << 20, min(vmem_budget, 100 << 20))

    cost = pl.CostEstimate(
        flops=2 * M * C * (3 * Hp),
        transcendentals=M * Hp,
        bytes_accessed=(x2d.size + w_gu.size + w_down.size + Mp * C) * itemsize,
    )

    out2d = pl.pallas_call(
        mlp_kernel,
        out_shape=jax.ShapeDtypeStruct((Mp, C), dtype),
        grid=grid,
        in_specs=[
            pl.BlockSpec((tm_eff, C), lambda i: (i, 0)),      # activations
            pl.BlockSpec((C, 2 * Hp), lambda i: (0, 0)),      # resident Wg|Wu
            pl.BlockSpec((Hp, C), lambda i: (0, 0)),          # resident Wd
        ],
        out_specs=pl.BlockSpec((tm_eff, C), lambda i: (i, 0)),
        compiler_params=pltpu.CompilerParams(
            dimension_semantics=("parallel",),
            vmem_limit_bytes=vmem_budget,
        ),
        cost_estimate=cost,
    )(x2d, w_gu, w_down)

    return out2d[:M].reshape(B, T, C)


def init_params(key, n_embd, mlp_ratio):
    """Deterministic init mirroring nn.Linear's default U(-1/sqrt(fan_in), ...)."""
    hidden_dim = int(n_embd * mlp_ratio) - 1       # matches the PyTorch module
    k_g, k_u, k_d = jax.random.split(key, 3)

    bound_in = 1.0 / math.sqrt(n_embd)
    bound_hid = 1.0 / math.sqrt(hidden_dim)

    # stored as (in_features, out_features) == PyTorch weight.T
    w_gate = jax.random.uniform(k_g, (n_embd, hidden_dim), jnp.float32,
                                minval=-bound_in, maxval=bound_in)
    w_up = jax.random.uniform(k_u, (n_embd, hidden_dim), jnp.float32,
                              minval=-bound_in, maxval=bound_in)
    w_down = jax.random.uniform(k_d, (hidden_dim, n_embd), jnp.float32,
                                minval=-bound_hid, maxval=bound_hid)
    return w_gate, w_up, w_down


def mlp_reference(x, w_gate, w_up, w_down):
    gate = jnp.einsum("btc,ch->bth", x, w_gate)
    up = jnp.einsum("btc,ch->bth", x, w_up)
    h = gate * jax.nn.sigmoid(gate) * up
    return jnp.einsum("bth,hc->btc", h, w_down)


if __name__ == "__main__":
    # config: n_embd=32, mlp_ratio=4  =>  hidden_dim = 32*4 - 1 = 127
    n_embd, mlp_ratio = 32, 4
    B, T = 2, 8

    key = jax.random.PRNGKey(0)
    k_x, k_w = jax.random.split(key)
    x = jax.random.normal(k_x, (B, T, n_embd), dtype=jnp.float32)
    w_gate, w_up, w_down = init_params(k_w, n_embd, mlp_ratio)

    out = mlp_pallas(x, w_gate, w_up, w_down)
    out = jax.block_until_ready(out)

    ref = mlp_reference(x, w_gate, w_up, w_down)
    assert out.shape == (B, T, n_embd)
    assert jnp.allclose(out, ref, atol=1e-5, rtol=1e-5), "mismatch vs reference"

    print("KERNEL_OK")
</pallas_src>

<mosaic_0001>
module attributes {stable_mosaic.version = 11 : i64} {
  func.func @mlp_kernel(%arg0: i32, %arg1: memref<16x32xf32, #tpu.memory_space<vmem>>, %arg2: memref<32x256xf32, #tpu.memory_space<vmem>>, %arg3: memref<128x32xf32, #tpu.memory_space<vmem>>, %arg4: memref<16x32xf32, #tpu.memory_space<vmem>>) attributes {dimension_semantics = [#tpu.dimension_semantics<parallel>], iteration_bounds = array<i64: 1>, scalar_prefetch = 0 : i64, scratch_operands = 0 : i64, tpu.core_type = #tpu.core_type<tc>, window_params = [{transform_indices = @transform_0, window_bounds = array<i64: 16, 32>}, {pipeline_mode = #tpu.pipeline_mode<synchronous>, transform_indices = @transform_1, window_bounds = array<i64: 32, 256>}, {pipeline_mode = #tpu.pipeline_mode<synchronous>, transform_indices = @transform_2, window_bounds = array<i64: 128, 32>}, {transform_indices = @transform_3, window_bounds = array<i64: 16, 32>}]} {
    %c0 = arith.constant 0 : index
    %c0_0 = arith.constant 0 : index
    %0 = vector.load %arg1[%c0, %c0_0] : memref<16x32xf32, #tpu.memory_space<vmem>>, vector<16x32xf32>
    %c0_1 = arith.constant 0 : index
    %c0_2 = arith.constant 0 : index
    %1 = vector.load %arg2[%c0_1, %c0_2] : memref<32x256xf32, #tpu.memory_space<vmem>>, vector<32x256xf32>
    %cst = arith.constant dense<0.000000e+00> : vector<16x256xf32>
    %2 = tpu.matmul %0, %1, %cst {dimension_numbers = #tpu.dot_dimension_numbers<[1], [0], [0], [1], [0, 0, 1, 1], [], []>} : vector<16x32xf32>, vector<32x256xf32>, vector<16x256xf32> -> vector<16x256xf32>
    %3 = vector.extract_strided_slice %2 {offsets = [0, 0], sizes = [16, 128], strides = [1, 1]} : vector<16x256xf32> to vector<16x128xf32>
    %4 = vector.extract_strided_slice %2 {offsets = [0, 128], sizes = [16, 128], strides = [1, 1]} : vector<16x256xf32> to vector<16x128xf32>
    %5 = arith.negf %3 : vector<16x128xf32>
    %6 = math.exp %5 : vector<16x128xf32>
    %cst_3 = arith.constant 1.000000e+00 : f32
    %7 = vector.broadcast %cst_3 : f32 to vector<16x128xf32>
    %8 = arith.addf %7, %6 : vector<16x128xf32>
    %9 = arith.divf %7, %8 : vector<16x128xf32>
    %10 = arith.mulf %3, %9 : vector<16x128xf32>
    %11 = arith.mulf %10, %4 : vector<16x128xf32>
    %c0_4 = arith.constant 0 : index
    %c0_5 = arith.constant 0 : index
    %12 = vector.load %arg3[%c0_4, %c0_5] : memref<128x32xf32, #tpu.memory_space<vmem>>, vector<128x32xf32>
    %cst_6 = arith.constant dense<0.000000e+00> : vector<16x32xf32>
    %13 = tpu.matmul %11, %12, %cst_6 {dimension_numbers = #tpu.dot_dimension_numbers<[1], [0], [0], [1], [0, 0, 1, 1], [], []>} : vector<16x128xf32>, vector<128x32xf32>, vector<16x32xf32> -> vector<16x32xf32>
    %c0_7 = arith.constant 0 : index
    %c0_8 = arith.constant 0 : index
    %14 = vector.load %arg4[%c0_7, %c0_8] : memref<16x32xf32, #tpu.memory_space<vmem>>, vector<16x32xf32>
    tpu.vector_store %arg4[%c0_7, %c0_8], %13 {strides = array<i32>} : memref<16x32xf32, #tpu.memory_space<vmem>>, vector<16x32xf32>,
    return
  }
  func.func @transform_0(%arg0: i32) -> (i32, i32) {
    %c0_i32 = arith.constant 0 : i32
    %c0_i32_0 = arith.constant 0 : i32
    return %arg0, %c0_i32 : i32, i32
  }
  func.func @transform_1(%arg0: i32) -> (i32, i32) {
    %c0_i32 = arith.constant 0 : i32
    %c0_i32_0 = arith.constant 0 : i32
    %c0_i32_1 = arith.constant 0 : i32
    return %c0_i32, %c0_i32_0 : i32, i32
  }
  func.func @transform_2(%arg0: i32) -> (i32, i32) {
    %c0_i32 = arith.constant 0 : i32
    %c0_i32_0 = arith.constant 0 : i32
    %c0_i32_1 = arith.constant 0 : i32
    return %c0_i32, %c0_i32_0 : i32, i32
  }
  func.func @transform_3(%arg0: i32) -> (i32, i32) {
    %c0_i32 = arith.constant 0 : i32
    %c0_i32_0 = arith.constant 0 : i32
    return %arg0, %c0_i32 : i32, i32
  }
}

</mosaic_0001>

<bundles_post_ra>
// kernel: tpu_custom_call.1
= control target key start
LH: loop header
LB: loop body
LE: loop exit
PB: predicated region body
PF: predicated region fallthrough
CT: control target
= control target key end

     0   :  { %v367_v7 = vmov 0.0   ;;  %s485_s0 = inlined_call_operand.vmem [shape: f32[16,32], index: 0, kind: input, shape index: {}]   ;;  %s486_s1 = inlined_call_operand.vmem [shape: f32[32,256], index: 1, kind: input, shape index: {}]   ;;  %s487_s2 = inlined_call_operand.vmem [shape: f32[128,32], index: 2, kind: input, shape index: {}]   ;;  %s488_s3 = inlined_call_operand.hbm [shape: f32[16,32], index: 3, kind: output, shape index: {}]  }
   0x1   :  { %v18_v0 = vld [vmem:[%s486_s1 + $0x8] sm:$0xff]  ;;  %v20_v1 = vld [vmem:[%s486_s1 + $0x18] sm:$0xff]  ;;  %v17_v2 = vld [vmem:[%s486_s1] sm:$0xff]  ;;  %96 = vmatprep.mubr.f32.mxu0 %v367_v7 }
   0x2   :  { %v291_v3 = vpack.c.bf16 %v20_v1, %v18_v0  ;;  %v19_v4 = vld [vmem:[%s486_s1 + $0x10] sm:$0xff]  ;;  %v22_v5 = vld [vmem:[%s486_s1 + $0x28] sm:$0xff]  ;;  %v24_v6 = vld [vmem:[%s486_s1 + $0x38] sm:$0xff] }
   0x3   :  { %v293_v8 = vpack.c.bf16 %v19_v4, %v17_v2  ;;  %v295_v9 = vpack.c.bf16 %v24_v6, %v22_v5  ;;  %v21_v10 = vld [vmem:[%s486_s1 + $0x20] sm:$0xff]  ;;  %v23_v11 = vld [vmem:[%s486_s1 + $0x30] sm:$0xff] }
   0x4   :  { %292 = vmatprep.subr.bf16.mxu0 %v291_v3 }
   0x5   :  { %8 = vsyncpa [#allocation3], 0  ;;  %294 = vmatpush1.bf16.msra.mxu0 %v293_v8  ;;  %v297_v12 = vpack.c.bf16 %v23_v11, %v21_v10  ;;  %v15_v13 = vld [vmem:[%s485_s0] sm:$0xff]  ;;  %vm25_vm0 = vcmask 261120   ;;  %v16_v14 = vld [vmem:[%s485_s0 + $0x8] sm:$0xff] }
   0x6   :  { %296 = vmatprep.subr.bf16.mxu0 %v295_v9  ;;  %v125_v15 = vld [vmem:[%s487_s2] sm:$0xff]  ;;  %v126_v16 = vld [vmem:[%s487_s2 + $0x8] sm:$0xff]  ;;  %v127_v18 = vld [vmem:[%s487_s2 + $0x10] sm:$0xff] }
   0x7   :  { %v299_v17 = vpack.c.bf16 %v126_v16, %v125_v15  ;;  %v128_v19 = vld [vmem:[%s487_s2 + $0x18] sm:$0xff]  ;;  %v129_v21 = vld [vmem:[%s487_s2 + $0x20] sm:$0xff]  ;;  %v130_v22 = vld [vmem:[%s487_s2 + $0x28] sm:$0xff] }
   0x8   :  { %v303_v20 = vpack.c.bf16 %v128_v19, %v127_v18  ;;  %v307_v23 = vpack.c.bf16 %v130_v22, %v129_v21  ;;  %v131_v24 = vld [vmem:[%s487_s2 + $0x30] sm:$0xff]  ;;  %v132_v25 = vld [vmem:[%s487_s2 + $0x38] sm:$0xff]  ;;  %v133_v27 = vld [vmem:[%s487_s2 + $0x40] sm:$0xff] }
   0x9   :  { %298 = vmatpush1.bf16.msra.mxu0 %v297_v12  ;;  %300 = vmatprep.subr.bf16.mxu1 %v299_v17  ;;  %v311_v26 = vpack.c.bf16 %v132_v25, %v131_v24  ;;  %v134_v28 = vld [vmem:[%s487_s2 + $0x48] sm:$0xff]  ;;  %v135_v30 = vld [vmem:[%s487_s2 + $0x50] sm:$0xff]  ;;  %v136_v31 = vld [vmem:[%s487_s2 + $0x58] sm:$0xff] }
   0xa   :  { %302 = vmatpush3.bf16.msra.mxu1 %v299_v17  ;;  %v315_v29 = vpack.c.bf16 %v134_v28, %v133_v27  ;;  %v319_v32 = vpack.c.bf16 %v136_v31, %v135_v30  ;;  %v137_v33 = vld [vmem:[%s487_s2 + $0x60] sm:$0xff]  ;;  %v138_v34 = vld [vmem:[%s487_s2 + $0x68] sm:$0xff]  ;;  %v139_v36 = vld [vmem:[%s487_s2 + $0x70] sm:$0xff] }
   0xb   :  { %304 = vmatprep.subr.bf16.mxu1 %v303_v20  ;;  %v323_v35 = vpack.c.bf16 %v138_v34, %v137_v33  ;;  %v140_v37 = vld [vmem:[%s487_s2 + $0x78] sm:$0xff]  ;;  %s368_s2 = smov [#allocation2]  }
   0xc   :  { %234 = vmatmul.mubr.msk.f32.vlgmr.msra.gmra.mrb[0].mxu0 %vm25_vm0, %v15_v13  ;;  %v327_v38 = vpack.c.bf16 %v140_v37, %v139_v36  ;;  %s223_s7 = sshll.u32 %s368_s2, 4  ;;  %s224_s7 = int_to_ptr.vmem [resolvable:$true] %s223_s7 }
   0xd   :  { %102 = vmatprep.mubr.f32.mxu0 %v367_v7  ;;  %s343_s8 = scalar_lea.vmem %s224_s7, 256  ;;  %p348_p1 = scmp.lt.s32.totalorder %s224_s7, %s224_s7 }
   0xe   :  { %306 = vmatpush3.bf16.msra.mxu1 %v303_v20  ;;  %p344_p0 = scmp.ne.s32.totalorder %s224_s7, %s343_s8  ;;  %p349_p2 = scmp.lt.s32.totalorder %s343_s8, %s343_s8 }
   0xf   :  { %308 = vmatprep.subr.bf16.mxu1 %v307_v23 }
  0x10   :  { %235 = vmatmul.mubr.msk.f32.gmra.mrb[2].mxu0 %vm25_vm0, %v16_v14  ;;  %p350_p3 = por %p349_p2, %p348_p1 }
  0x12   :  { %310 = vmatpush3.bf16.msra.mxu1 %v307_v23  ;;  %p351_p4 = pnand %p350_p3, %p344_p0 }
  0x13   :  { %312 = vmatprep.subr.bf16.mxu1 %v311_v26 }
  0x16   :  { %314 = vmatpush3.bf16.msra.mxu1 %v311_v26 }
  0x17   :  { %316 = vmatprep.subr.bf16.mxu1 %v315_v29 }
  0x1a   :  { %318 = vmatpush3.bf16.msra.mxu1 %v315_v29 }
  0x1b   :  { %320 = vmatprep.subr.bf16.mxu1 %v319_v32 }
  0x1e   :  { %322 = vmatpush3.bf16.msra.mxu1 %v319_v32 }
  0x1f   :  { %324 = vmatprep.subr.bf16.mxu1 %v323_v35 }
  0x22   :  { %326 = vmatpush3.bf16.msra.mxu1 %v323_v35 }
  0x23   :  { %328 = vmatprep.subr.bf16.mxu1 %v327_v38 }
  0x26   :  { %330 = vmatpush3.bf16.msra.mxu1 %v327_v38 }
  0xdf   :  { %v98_v39 = vpop.f32.mrb[0].mxu0 }
  0xe0   :  { %v236_v40 = vmul.f32 -1.442695, %v98_v39  ;;  %v100_v41 = vpop.f32.mrb[1].mxu0 }
  0xe2   :  { %335 = vpow2.f32 %v236_v40 }
  0xe3   :  { %v104_v42 = vpop.f32.mrb[2].mxu0 }
  0xe4   :  { %v237_v43 = vmul.f32 -1.442695, %v104_v42  ;;  %v106_v44 = vpop.f32.mrb[3].mxu0 }
  0xe6   :  { %337 = vpow2.f32 %v237_v43 }
  0xec   :  { %v336_v45 = vpop.eup %335 }
  0xed   :  { %v115_v46 = vadd.f32 1.0, %v336_v45 }
  0xef   :  { %339 = vrcp.f32 %v115_v46 }
  0xf0   :  { %v338_v47 = vpop.eup %337 }
  0xf1   :  { %v116_v48 = vadd.f32 1.0, %v338_v47 }
  0xf3   :  { %341 = vrcp.f32 %v116_v48 }
  0xf9   :  { %v340_v49 = vpop.eup %339 }
  0xfa   :  { %v121_v50 = vmul.f32 %v340_v49, %v98_v39 }
  0xfc   :  { %v123_v51 = vmul.f32 %v121_v50, %v100_v41 }
  0xfd   :  { %v342_v52 = vpop.eup %341 }
  0xfe   :  { %v122_v53 = vmul.f32 %v342_v52, %v104_v42  ;;  %288 = vmatprep.mubr.f32.mxu1 %v123_v51 }
 0x100   :  { %v124_v54 = vmul.f32 %v122_v53, %v106_v44 }
 0x102   :  { %289 = vmatmul.mubr.f32.vlgmr.msra.gmra.mrb[0].mxu1 %v124_v54 }
 0x1d5   :  { %v290_v55 = vpop.f32.mrb[0].mxu1 }
 0x1d6   :  { %217 = vst.msk [vmem:[#allocation2 + $0x8] sm:$0xff] %vm25_vm0, %v290_v55  ;;  %v207_v56 = vpop.f32.mrb[1].mxu1 }
 0x1d7   :  { %216 = vst.msk [vmem:[#allocation2] sm:$0xff] %vm25_vm0, %v207_v56 }
 0x1d8   :  { %354 = shalt.err (!%p351_p4)
}
 0x1d9   :  { %s355_s11 = scalar_lea.hbm %s488_s3, 256 }
 0x1da   :  { %p356_p5 = scmp.ne.s32.totalorder %s488_s3, %s355_s11  ;;  %p359_p6 = scmp.lt.u32.totalorder %s355_s11, %s488_s3 }
 0x1dc   :  { %p361_p7 = pnand %p359_p6, %p356_p5 }
 0x1de   :  { %364 = shalt.err (!%p361_p7)
}
 0x1df   :  { %s369_s15 = smov 128   ;;  %s370_s16 = smov 8  }
 0x1e0   :  { %229 = dma.vmem_to_hbm [thread:$0]  %s224_s7, 256, %s488_s3, [#allocation3], %s369_s15, %s369_s15, %s370_s16  }
 0x1e1   :  { %365 = dma.done.wait [#allocation3], 256  }
 0x1e2   :  { %366 = vsyncadd [#allocation3], 4294967040 }
 0x1e3   :  { %233 = vsyncpa [#allocation3], 1 }

</bundles_post_ra>
